<compile_context>
chip_gen: v5e
topology: v5e:2x2
jax: 0.10.0
libtpu: 0.0.40
codegen_flags: <defaults>
</compile_context>

<pallas_src>
import functools

import jax
import jax.numpy as jnp
from jax import lax
from jax.experimental import pallas as pl
from jax.experimental.pallas import tpu as pltpu


def _focal_loss_kernel(x_ref, t_ref, cnt_ref, s_ref, *, gamma, l_actual):
    # x_ref  : (1, C, TL)   logits tile in input dtype, classes on sublanes
    # t_ref  : (1, 1, TL)   class ids in source dtype, lane-dense
    # cnt_ref: (1, 1, C, 1) f32 per-class pixel counts for this (batch, tile)
    # s_ref  : (1, 1, C, 1) f32 per-class sums of focal*log_p for this tile
    x = x_ref[0].astype(jnp.float32)                         # (C, TL)
    t = t_ref[0].astype(jnp.int32)                           # (1, TL)
    c, tl_blk = x.shape

    # lane validity mask: the ragged edge tile is NOT padded in HBM, stale
    # lanes are neutralized here (all math below is lane-local).
    col = lax.broadcasted_iota(jnp.int32, (1, tl_blk), 1) + pl.program_id(1) * tl_blk
    valid = col < l_actual                                   # (1, TL) bool

    # class-selection mask; no float one-hot is materialized
    cls = lax.broadcasted_iota(jnp.int32, (c, tl_blk), 0)
    sel = (cls == t) & valid                                  # (C, TL) bool

    # true-class softmax probability without a full (C,TL) normalization
    m = jnp.max(x, axis=0, keepdims=True)                     # (1, TL)
    e = jnp.exp(x - m)                                        # (C, TL)
    denom = jnp.sum(e, axis=0, keepdims=True)                 # (1, TL)
    e_true = jnp.max(jnp.where(sel, e, 0.0), axis=0, keepdims=True)   # (1, TL)
    probs = e_true * pl.reciprocal(denom) + 1e-5              # exact recip (tolerance)
    log_p = jnp.log(probs)

    one_m = 1.0 - probs
    if isinstance(gamma, int):
        focal = lax.integer_pow(one_m, gamma)                 # VPU, no log/exp
    else:
        # probs = p + 1e-5 can exceed 1 -> clamp so float gamma never NaNs
        focal = jnp.maximum(one_m, 0.0) ** gamma

    # per-pixel focal*log_p, garbage/NaN in masked lanes is selected away
    f = jnp.where(valid, focal * log_p, 0.0)                  # (1, TL)

    # per-class partial sums (lane reductions -> XLU)
    cnt = jnp.sum(sel.astype(jnp.float32), axis=1, keepdims=True)   # (C, 1)
    s = jnp.sum(jnp.where(sel, f, 0.0), axis=1, keepdims=True)      # (C, 1)

    cnt_ref[...] = cnt.reshape(1, 1, c, 1)
    s_ref[...] = s.reshape(1, 1, c, 1)


def focal_loss(logits_nchw, target_nhw, gamma=2):
    n, c, h, w = logits_nchw.shape
    L = h * w

    # channels-first: NCHW -> (N, C, L) is a free reshape (no transpose, no cast)
    x = logits_nchw.reshape(n, c, L)
    # targets stay at their source width on the wire (uint8/int16/int32)
    t = target_nhw.reshape(n, 1, L)

    x_bytes = jnp.dtype(x.dtype).itemsize
    t_bytes = jnp.dtype(t.dtype).itemsize

    # L-tile from a VMEM budget (headroom under v7x's 64 MiB per TC):
    # per lane: double-buffered x and t blocks + ~8 f32 (C,TL) compiler temps.
    bytes_per_lane = 2 * c * x_bytes + 2 * t_bytes + 8 * c * 4
    budget = 40 * 1024 * 1024
    tl_cap = max(128, min(64 * 1024, (budget // bytes_per_lane) // 128 * 128))

    # Either one full-extent block (block dim == array dim, always legal) or a
    # 128-multiple tile smaller than L; the ragged edge is masked in-kernel.
    tl = L if L <= tl_cap else tl_cap
    num_tiles = pl.cdiv(L, tl)

    kernel = functools.partial(_focal_loss_kernel, gamma=gamma, l_actual=L)
    counts, s = pl.pallas_call(
        kernel,
        out_shape=(jax.ShapeDtypeStruct((n, num_tiles, c, 1), jnp.float32),
                   jax.ShapeDtypeStruct((n, num_tiles, c, 1), jnp.float32)),
        grid_spec=pltpu.PrefetchScalarGridSpec(
            num_scalar_prefetch=0,
            grid=(n, num_tiles),
            in_specs=[
                pl.BlockSpec((1, c, tl), lambda i, j: (i, 0, j)),
                pl.BlockSpec((1, 1, tl), lambda i, j: (i, 0, j)),
            ],
            out_specs=[
                pl.BlockSpec((1, 1, c, 1), lambda i, j: (i, j, 0, 0)),
                pl.BlockSpec((1, 1, c, 1), lambda i, j: (i, j, 0, 0)),
            ],
        ),
        compiler_params=pltpu.CompilerParams(
            dimension_semantics=("parallel", "parallel"),
            vmem_limit_bytes=48 * 1024 * 1024),
    )(x, t)

    # combine single-pass partials:
    #   per-pixel loss = -(1 - cw[t]) * F = -F + cw[t]*F,  F = focal * log_p
    #   => sum = sum_c cw[b,c] * S[b,c] - sum_c S[b,c]
    freq = jnp.sum(counts, axis=(1, 3))           # (n, c)
    S = jnp.sum(s, axis=(1, 3))                   # (n, c)
    hist = jnp.sum(freq, axis=1, keepdims=True)   # (n, 1)
    cw = freq / (hist + 1.0)                      # (n, c) classweights
    loss_sum = jnp.sum(cw * S) - jnp.sum(S)
    return loss_sum / (n * L)


def focal_loss_ref(logits_nchw, target_nhw, gamma=2):
    """Pure-JAX reference mirroring the PyTorch forward."""
    n, c, h, w = logits_nchw.shape
    inputs = jnp.transpose(logits_nchw, (0, 2, 3, 1)).reshape(n, -1, c).astype(jnp.float32)
    targets = target_nhw.reshape(n, -1)
    onehot = jax.nn.one_hot(targets, c, dtype=jnp.float32)
    frequency = onehot.sum(axis=1)                            # (n, c)
    hist_num = frequency.sum(axis=1, keepdims=True)
    classweights = frequency / (hist_num + 1.0)
    weights = 1.0 - jnp.take_along_axis(classweights, targets, axis=1)
    P = jax.nn.softmax(inputs, axis=2)
    probs = (P * onehot).sum(axis=2) + 1e-5
    log_p = jnp.log(probs)
    batch_loss = -weights * (1.0 - probs) ** gamma * log_p
    return batch_loss.mean()


if __name__ == "__main__":
    key = jax.random.PRNGKey(0)
    k1, k2, k3, k4, k5, k6 = jax.random.split(key, 6)

    # case 1: lane-aligned spatial size, f32 logits, int32 targets
    n, c, h, w = 2, 4, 16, 16
    logits = jax.random.normal(k1, (n, c, h, w), dtype=jnp.float32)
    target = jax.random.randint(k2, (n, h, w), 0, c, dtype=jnp.int32)
    loss = jax.block_until_ready(focal_loss(logits, target, gamma=2))
    ref = jax.block_until_ready(focal_loss_ref(logits, target, gamma=2))
    assert jnp.allclose(loss, ref, rtol=1e-5, atol=1e-6), (loss, ref)

    # case 2: spatial size not a multiple of 128 (exercises the un-padded path)
    n2, c2, h2, w2 = 2, 5, 10, 10
    logits2 = jax.random.normal(k3, (n2, c2, h2, w2), dtype=jnp.float32)
    target2 = jax.random.randint(k4, (n2, h2, w2), 0, c2, dtype=jnp.int32)
    loss2 = jax.block_until_ready(focal_loss(logits2, target2, gamma=2))
    ref2 = jax.block_until_ready(focal_loss_ref(logits2, target2, gamma=2))
    assert jnp.allclose(loss2, ref2, rtol=1e-5, atol=1e-6), (loss2, ref2)

    # case 3: bf16 logits + uint8 labels stay narrow on the HBM wire
    n3, c3, h3, w3 = 2, 4, 8, 16
    logits3 = jax.random.normal(k5, (n3, c3, h3, w3), dtype=jnp.bfloat16)
    target3 = jax.random.randint(k6, (n3, h3, w3), 0, c3, dtype=jnp.int32).astype(jnp.uint8)
    loss3 = jax.block_until_ready(focal_loss(logits3, target3, gamma=2))
    ref3 = jax.block_until_ready(focal_loss_ref(logits3, target3, gamma=2))
    assert jnp.allclose(loss3, ref3, rtol=1e-4, atol=1e-5), (loss3, ref3)

    print("KERNEL_OK")
</pallas_src>

<mosaic_0001>
module attributes {stable_mosaic.version = 11 : i64} {
  func.func @_focal_loss_kernel(%arg0: i32, %arg1: i32, %arg2: memref<1x4x256xf32, #tpu.memory_space<vmem>>, %arg3: memref<1x1x256xi32, #tpu.memory_space<vmem>>, %arg4: memref<1x1x4x1xf32, #tpu.memory_space<vmem>>, %arg5: memref<1x1x4x1xf32, #tpu.memory_space<vmem>>) attributes {dimension_semantics = [#tpu.dimension_semantics<parallel>, #tpu.dimension_semantics<parallel>], iteration_bounds = array<i64: 2, 1>, scalar_prefetch = 0 : i64, scratch_operands = 0 : i64, tpu.core_type = #tpu.core_type<tc>, window_params = [{transform_indices = @transform_0, window_bounds = array<i64: 1, 4, 256>}, {transform_indices = @transform_1, window_bounds = array<i64: 1, 1, 256>}, {transform_indices = @transform_2, window_bounds = array<i64: 1, 1, 4, 1>}, {transform_indices = @transform_3, window_bounds = array<i64: 1, 1, 4, 1>}]} {
    %c0 = arith.constant 0 : index
    %c0_0 = arith.constant 0 : index
    %c0_1 = arith.constant 0 : index
    %0 = vector.load %arg2[%c0, %c0_0, %c0_1] : memref<1x4x256xf32, #tpu.memory_space<vmem>>, vector<1x4x256xf32>
    %1 = vector.shape_cast %0 : vector<1x4x256xf32> to vector<4x256xf32>
    %c0_2 = arith.constant 0 : index
    %c0_3 = arith.constant 0 : index
    %c0_4 = arith.constant 0 : index
    %2 = vector.load %arg3[%c0_2, %c0_3, %c0_4] : memref<1x1x256xi32, #tpu.memory_space<vmem>>, vector<1x1x256xi32>
    %3 = vector.shape_cast %2 : vector<1x1x256xi32> to vector<1x256xi32>
    %4 = tpu.iota {dimensions = array<i32: 1>} : vector<1x256xi32>
    %c256_i32 = arith.constant 256 : i32
    %5 = arith.muli %arg1, %c256_i32 : i32
    %6 = vector.broadcast %5 : i32 to vector<1x256xi32>
    %7 = arith.addi %4, %6 : vector<1x256xi32>
    %c256_i32_5 = arith.constant 256 : i32
    %8 = vector.broadcast %c256_i32_5 : i32 to vector<1x256xi32>
    %9 = arith.cmpi slt, %7, %8 : vector<1x256xi32>
    %10 = tpu.iota {dimensions = array<i32: 0>} : vector<4x256xi32>
    %11 = vector.broadcast %3 : vector<1x256xi32> to vector<4x256xi32>
    %12 = arith.cmpi eq, %10, %11 : vector<4x256xi32>
    %13 = vector.broadcast %9 : vector<1x256xi1> to vector<4x256xi1>
    %14 = arith.andi %12, %13 : vector<4x256xi1>
    %cst = arith.constant dense<0xFF800000> : vector<256xf32>
    %15 = vector.multi_reduction <maximumf>, %1, %cst [0] : vector<4x256xf32> to vector<256xf32>
    %16 = vector.shape_cast %15 : vector<256xf32> to vector<1x256xf32>
    %17 = vector.broadcast %16 : vector<1x256xf32> to vector<4x256xf32>
    %18 = arith.subf %1, %17 : vector<4x256xf32>
    %19 = math.exp %18 : vector<4x256xf32>
    %cst_6 = arith.constant dense<0.000000e+00> : vector<256xf32>
    %20 = vector.multi_reduction <add>, %19, %cst_6 [0] : vector<4x256xf32> to vector<256xf32>
    %21 = vector.shape_cast %20 : vector<256xf32> to vector<1x256xf32>
    %cst_7 = arith.constant 0.000000e+00 : f32
    %22 = vector.broadcast %cst_7 : f32 to vector<4x256xf32>
    %23 = arith.select %14, %19, %22 : vector<4x256xi1>, vector<4x256xf32>
    %cst_8 = arith.constant dense<0xFF800000> : vector<256xf32>
    %24 = vector.multi_reduction <maximumf>, %23, %cst_8 [0] : vector<4x256xf32> to vector<256xf32>
    %25 = vector.shape_cast %24 : vector<256xf32> to vector<1x256xf32>
    %26 = tpu.reciprocal %21 : vector<1x256xf32> -> vector<1x256xf32>
    %27 = arith.mulf %25, %26 : vector<1x256xf32>
    %cst_9 = arith.constant 9.99999974E-6 : f32
    %28 = vector.broadcast %cst_9 : f32 to vector<1x256xf32>
    %29 = arith.addf %27, %28 : vector<1x256xf32>
    %30 = math.log %29 : vector<1x256xf32>
    %cst_10 = arith.constant 1.000000e+00 : f32
    %31 = vector.broadcast %cst_10 : f32 to vector<1x256xf32>
    %32 = arith.subf %31, %29 : vector<1x256xf32>
    %33 = arith.mulf %32, %32 : vector<1x256xf32>
    %34 = arith.mulf %33, %30 : vector<1x256xf32>
    %cst_11 = arith.constant 0.000000e+00 : f32
    %35 = vector.broadcast %cst_11 : f32 to vector<1x256xf32>
    %36 = arith.select %9, %34, %35 : vector<1x256xi1>, vector<1x256xf32>
    %37 = arith.extui %14 : vector<4x256xi1> to vector<4x256xi32>
    %38 = arith.sitofp %37 : vector<4x256xi32> to vector<4x256xf32>
    %cst_12 = arith.constant dense<0.000000e+00> : vector<4xf32>
    %39 = vector.multi_reduction <add>, %38, %cst_12 [1] : vector<4x256xf32> to vector<4xf32>
    %40 = vector.shape_cast %39 : vector<4xf32> to vector<4x1xf32>
    %cst_13 = arith.constant 0.000000e+00 : f32
    %41 = vector.shape_cast %36 : vector<1x256xf32> to vector<1x256xf32>
    %42 = vector.broadcast %41 : vector<1x256xf32> to vector<4x256xf32>
    %43 = vector.broadcast %cst_13 : f32 to vector<4x256xf32>
    %44 = arith.select %14, %42, %43 : vector<4x256xi1>, vector<4x256xf32>
    %cst_14 = arith.constant dense<0.000000e+00> : vector<4xf32>
    %45 = vector.multi_reduction <add>, %44, %cst_14 [1] : vector<4x256xf32> to vector<4xf32>
    %46 = vector.shape_cast %45 : vector<4xf32> to vector<4x1xf32>
    %47 = vector.shape_cast %40 : vector<4x1xf32> to vector<1x1x4x1xf32>
    %c0_15 = arith.constant 0 : index
    %c0_16 = arith.constant 0 : index
    %c0_17 = arith.constant 0 : index
    %c0_18 = arith.constant 0 : index
    %48 = vector.load %arg4[%c0_15, %c0_16, %c0_17, %c0_18] : memref<1x1x4x1xf32, #tpu.memory_space<vmem>>, vector<1x1x4x1xf32>
    tpu.vector_store %arg4[%c0_15, %c0_16, %c0_17, %c0_18], %47 {strides = array<i32>} : memref<1x1x4x1xf32, #tpu.memory_space<vmem>>, vector<1x1x4x1xf32>,
    %49 = vector.shape_cast %46 : vector<4x1xf32> to vector<1x1x4x1xf32>
    %c0_19 = arith.constant 0 : index
    %c0_20 = arith.constant 0 : index
    %c0_21 = arith.constant 0 : index
    %c0_22 = arith.constant 0 : index
    %50 = vector.load %arg5[%c0_19, %c0_20, %c0_21, %c0_22] : memref<1x1x4x1xf32, #tpu.memory_space<vmem>>, vector<1x1x4x1xf32>
    tpu.vector_store %arg5[%c0_19, %c0_20, %c0_21, %c0_22], %49 {strides = array<i32>} : memref<1x1x4x1xf32, #tpu.memory_space<vmem>>, vector<1x1x4x1xf32>,
    return
  }
  func.func @transform_0(%arg0: i32, %arg1: i32) -> (i32, i32, i32) {
    %c0_i32 = arith.constant 0 : i32
    %c0_i32_0 = arith.constant 0 : i32
    return %arg0, %c0_i32, %arg1 : i32, i32, i32
  }
  func.func @transform_1(%arg0: i32, %arg1: i32) -> (i32, i32, i32) {
    %c0_i32 = arith.constant 0 : i32
    %c0_i32_0 = arith.constant 0 : i32
    return %arg0, %c0_i32, %arg1 : i32, i32, i32
  }
  func.func @transform_2(%arg0: i32, %arg1: i32) -> (i32, i32, i32, i32) {
    %c0_i32 = arith.constant 0 : i32
    %c0_i32_0 = arith.constant 0 : i32
    %c0_i32_1 = arith.constant 0 : i32
    return %arg0, %arg1, %c0_i32, %c0_i32_0 : i32, i32, i32, i32
  }
  func.func @transform_3(%arg0: i32, %arg1: i32) -> (i32, i32, i32, i32) {
    %c0_i32 = arith.constant 0 : i32
    %c0_i32_0 = arith.constant 0 : i32
    %c0_i32_1 = arith.constant 0 : i32
    return %arg0, %arg1, %c0_i32, %c0_i32_0 : i32, i32, i32, i32
  }
}

</mosaic_0001>

<bundles_post_ra>
// kernel: tpu_custom_call.1
= control target key start
LH: loop header
LB: loop body
LE: loop exit
PB: predicated region body
PF: predicated region fallthrough
CT: control target
= control target key end

     0   :  { %9 = vsyncpa [#allocation3], 0  ;;  %s951_s0 = inlined_call_operand.hbm [shape: f32[2,4,256], index: 0, kind: input, shape index: {}]   ;;  %s952_s1 = inlined_call_operand.hbm [shape: s32[2,1,256], index: 1, kind: input, shape index: {}]   ;;  %s953_s2 = inlined_call_operand.vmem [shape: f32[2,1,4,1], index: 2, kind: output, shape index: {0}]   ;;  %s954_s3 = inlined_call_operand.vmem [shape: f32[2,1,4,1], index: 3, kind: output, shape index: {1}]  }
   0x1   :  { %11 = vsyncpa [#allocation3 + $0x1], 0 }
   0x2   :  { %12 = vsyncpa [#allocation5], 0 }
   0x3   :  { %14 = vsyncpa [#allocation5 + $0x1], 0  ;;  %s812_s12 = smov 0   ;;  %s814_s13 = smov 0  }
   0x4   :  { %s816_s14 = smov 0   ;;  %s818_s15 = smov 0  }
   0x5   :  { %s820_s16 = smov 0   ;;  %s822_s17 = smov 0  }
   0x6 LB: > { %s585_s18 = sadd.s32 4294967295, %s789_s17   ;;  %s32_s19 = sadd.s32 1, %s785_s16  ;;  %s789_s17 = sphi %s822_s17, %s20_s17   ;;  %s785_s16 = sphi %s820_s16, %s966_s16   ;;  %s781_s15 = sphi %s818_s15, %s965_s15   ;;  %s777_s14 = sphi %s816_s14, %s964_s14   ;;  %s773_s13 = sphi %s814_s13, %s963_s13   ;;  %s769_s12 = sphi %s812_s12, %s962_s12  }
   0x7   : > { %p34_p0 = scmp.ge.s32.totalorder %s32_s19, 2  ;;  %s41_s20 = sadd.s32 1, %s777_s14 }
   0x8   : > { %p48_p1 = scmp.ne.s32.totalorder %s777_s14, %s773_s13  ;;  %p49_p2 = scmp.eq.s32.totalorder %s789_s17, 0 }
   0x9   : > { %s968_s19 = smov (%p34_p0, %s32_s19), 0  ;;  %p54_p4 = scmp.ne.s32.totalorder %s773_s13, %s769_s12 }
   0xa   : > { %p848_p3 = por %p49_p2, %p48_p1  ;;  %s36_s22 = ssub.s32 %s785_s16, %s968_s19 }
   0xb   : > { %p55_p5 = scmp.eq.s32.totalorder %s585_s18, 0  ;;  %p39_p6 = scmp.eq.s32.totalorder %s36_s22, 0 }
   0xc   : > { %p615_p8 = scmp.lt.s32.totalorder %s789_s17, 2  ;;  %s162_s25 = sand.u32 1, %s777_s14  }
   0xd   : > { %p855_p7 = por %p55_p5, %p54_p4  ;;  %s603_s26 = sshll.u32 %s785_s16, 3 }
   0xe   : > { %s861_s24 = scalar_select %p39_p6, %s777_s14, %s41_s20  }
   0xf   : > { %s589_s27 = sshll.u32 %s162_s25, 3  ;;  %s173_s30 = scalar_lea.hbm %s951_s0, %s603_s26 }
  0x10   : > { %s175_s4 = sshll.u32 %s173_s30, 4  ;;  %s166_s5 = scalar_lea.vmem [#allocation2], %s589_s27  ;;  %s176_s4 = int_to_ptr.hbm [resolvable:$true] %s175_s4 }
  0x11   : > { %s177_s6 = sshll.u32 %s166_s5, 4  ;;  %p870_p9 = pnand %p615_p8, %p848_p3  ;;  %s178_s6 = int_to_ptr.vmem [resolvable:$true] %s177_s6 }
  0x12   : > { %p594_p10 = scmp.ge.s32.totalorder %s789_s17, 1  ;;  %p203_p11 = scmp.lt.s32.totalorder %s789_s17, 3 }
  0x13   : > { %s592_s8 = sshll.u32 %s162_s25, 1  ;;  %s163_s9 = scalar_lea.sflag [#allocation3], %s162_s25 }
  0x14   : > { %611 = dma.hbm_to_vmem [thread:$0]  (!%p870_p9), %s176_s4, 128, %s178_s6, %s163_s9  }
  0x15   : > { %p204_p12 = pnand %p594_p10, %p203_p11  ;;  %s593_s10 = sshll.u32 %s785_s16, 1 }
  0x16   : > { %s188_s11 = scalar_lea.vmem [#allocation4], %s592_s8  ;;  %s194_s21 = scalar_lea.hbm %s952_s1, %s593_s10 }
  0x17   : > { %s198_s12 = sshll.u32 %s188_s11, 4  ;;  %s196_s22 = sshll.u32 %s194_s21, 4  ;;  %s199_s12 = int_to_ptr.vmem [resolvable:$true] %s198_s12  ;;  %s197_s22 = int_to_ptr.hbm [resolvable:$true] %s196_s22 }
  0x18   : > { %s185_s26 = scalar_lea.sflag [#allocation5], %s162_s25  ;;  %207 = sbr.rel (%p204_p12) target bundleno = 244 (0xf4), region = 28 }
  0x19   : > { %614 = dma.hbm_to_vmem [thread:$0]  (!%p870_p9), %s197_s22, 32, %s199_s12, %s185_s26  }
  0x1a   : > { %s209_s27 = sand.u32 (!%p204_p12), 1, %s773_s13  }
  0x1b   : > { %s595_s28 = sshll.u32 (!%p204_p12), %s209_s27, 3  ;;  %s210_s29 = scalar_lea.sflag (!%p204_p12), [#allocation3], %s209_s27 }
  0x1c   : > { %s213_s30 = scalar_lea.vmem (!%p204_p12), [#allocation2], %s595_s28 }
  0x1d   : > { %760 = dma.done.wait (%p855_p7), %s210_s29, 128  }
  0x1e   : > { %762 = vsyncadd (%p855_p7), %s210_s29, 4294967168  ;;  %s596_s4 = sshll.u32 %s209_s27, 1  ;;  %s220_s5 = scalar_lea.sflag [#allocation5], %s209_s27 }
  0x1f   : > { %s223_s6 = scalar_lea.vmem [#allocation4], %s596_s4 }
  0x20   : > { %764 = dma.done.wait (%p855_p7), %s220_s5, 32  }
  0x21   : > { %766 = vsyncadd (%p855_p7), %s220_s5, 4294967264  ;;  %v288_v0 = vlaneseq  ;;  %v277_v2 = vld [vmem:[%s213_s30] sm:$0xff]  ;;  %v278_v3 = vld [vmem:[%s223_s6] sm:$0x3]  ;;  %vm306_vm2 = vcmask 1043456   ;;  %v791_v8 = vmov 0.0  }
  0x22   : > { %301 = vst [vmem:[#allocation1] ss:$2 sm:$0xff] %v277_v2  ;;  %v290_v4 = vperm.slane %v278_v3, 0  ;;  %v291_v5 = vperm.slane %v278_v3, 1  ;;  %p263_p13 = scmp.lt.s32.totalorder %s781_s15, 1  ;;  %vm430_vm11 = vcmask 3072  }
  0x23   : > { %v289_v1 = vshrl.u32 %v288_v0, 7 }
  0x24   : > { %s970_s15 = smov (!%p263_p13, %s781_s15), 1 }
  0x25   : > { %vm893_vm0 = vcmp.eq.s32.totalorder %v289_v1, %v290_v4  ;;  %vm897_vm1 = vcmp.eq.s32.totalorder %v289_v1, %v291_v5  ;;  %s597_s23 = sshll.u32 %s970_s15, 2 }
  0x26   : > { %v599_v9 = vsel %vm893_vm0, 1.0, %v791_v8  ;;  %v600_v10 = vsel %vm897_vm1, 1.0, %v791_v8  ;;  %s269_s8 = scalar_lea.vmem %s953_s2, %s597_s23  ;;  %s276_s11 = scalar_lea.vmem %s954_s3, %s597_s23 }
  0x27   : > { %v418_v11 = vsel %vm306_vm2, %v599_v9, 0.0  ;;  %v419_v12 = vsel %vm306_vm2, %v600_v10, 0.0 }
  0x28   : > { %v420_v13 = vadd.f32 %v419_v12, %v418_v11 }
  0x29   : > { %v302_v14 = vld.sshfl [vmem:[#allocation1] sm:$0xff pattern:$0x75316420]  ;;  %v303_v15 = vld.sshfl [vmem:[#allocation1 + $0x8] sm:$0xff pattern:$0x75316420] }
  0x2a   : > { %421 = vadd.xlane.f32.xlu0 %v420_v13  ;;  %v307_v16 = vsel %vm306_vm2, %v302_v14, -inf  ;;  %v314_v17 = vsel %vm306_vm2, %v303_v15, -inf }
  0x2b   : > { %v308_v18 = vrot.slane %v307_v16, 4  ;;  %v315_v19 = vrot.slane %v314_v17, 4 }
  0x2d   : > { %v309_v20 = vmax.f32 %v307_v16, %v308_v18  ;;  %v316_v21 = vmax.f32 %v314_v17, %v315_v19 }
  0x2f   : > { %v310_v22 = vrot.slane %v309_v20, 2  ;;  %v317_v23 = vrot.slane %v316_v21, 2 }
  0x31   : > { %v311_v24 = vmax.f32 %v309_v20, %v310_v22  ;;  %v318_v25 = vmax.f32 %v316_v21, %v317_v23 }
  0x33   : > { %v312_v26 = vrot.slane %v311_v24, 1  ;;  %v319_v27 = vrot.slane %v318_v25, 1 }
  0x35   : > { %v313_v28 = vmax.f32 %v311_v24, %v312_v26  ;;  %v320_v29 = vmax.f32 %v318_v25, %v319_v27 }
  0x37   : > { %v323_v30 = vrot.slane %v320_v29, 4 }
  0x39   : > { %v324_v31 = vsel %vm306_vm2, %v313_v28, %v323_v30 }
  0x3a   : > { %v326_v32 = vsub.f32 %v277_v2, %v324_v31 }
  0x3c   : > { %v327_v33 = vmul.f32 1.442695, %v326_v32 }
  0x3e   : > { %665 = vpow2.f32 %v327_v33 }
  0x44   : > { %v666_v34 = vpop.eup %665 }
  0x45   : > { %330 = vst [vmem:[#allocation1] ss:$2 sm:$0xff] %v666_v34 }
  0x4c   : > { %v331_v35 = vld.sshfl [vmem:[#allocation1] sm:$0xff pattern:$0x75316420]  ;;  %v332_v36 = vld.sshfl [vmem:[#allocation1 + $0x8] sm:$0xff pattern:$0x75316420] }
  0x4d   : > { %349 = vst [vmem:[#allocation1] ss:$2 sm:$0xff] %v666_v34  ;;  %v335_v37 = vsel %vm306_vm2, %v331_v35, 0.0  ;;  %v342_v38 = vsel %vm306_vm2, %v332_v36, 0.0 }
  0x4e   : > { %v336_v39 = vrot.slane %v335_v37, 4  ;;  %v343_v40 = vrot.slane %v342_v38, 4 }
  0x50   : > { %v337_v41 = vadd.f32 %v336_v39, %v335_v37  ;;  %v344_v42 = vadd.f32 %v343_v40, %v342_v38 }
  0x52   : > { %v338_v43 = vrot.slane %v337_v41, 2  ;;  %v345_v44 = vrot.slane %v344_v42, 2 }
  0x54   : > { %v350_v45 = vld.sshfl [vmem:[#allocation1] sm:$0xff pattern:$0x75316420]  ;;  %v351_v46 = vld.sshfl [vmem:[#allocation1 + $0x8] sm:$0xff pattern:$0x75316420]  ;;  %v339_v47 = vadd.f32 %v338_v43, %v337_v41  ;;  %v346_v48 = vadd.f32 %v345_v44, %v344_v42 }
  0x55   : > { %v354_v49 = vsel %vm893_vm0, %v350_v45, 0.0  ;;  %v355_v50 = vsel %vm897_vm1, %v351_v46, 0.0 }
  0x56   : > { %v356_v51 = vsel %vm306_vm2, %v354_v49, -inf  ;;  %v363_v52 = vsel %vm306_vm2, %v355_v50, -inf  ;;  %v340_v53 = vrot.slane %v339_v47, 1  ;;  %v347_v54 = vrot.slane %v346_v48, 1 }
  0x57   : > { %v357_v55 = vrot.slane %v356_v51, 4  ;;  %v364_v56 = vrot.slane %v363_v52, 4 }
  0x58   : > { %v341_v57 = vadd.f32 %v340_v53, %v339_v47  ;;  %v348_v58 = vadd.f32 %v347_v54, %v346_v48 }
  0x59   : > { %v358_v59 = vmax.f32 %v356_v51, %v357_v55  ;;  %v365_v60 = vmax.f32 %v363_v52, %v364_v56 }
  0x5a   : > { %667 = vrcp.f32 %v341_v57  ;;  %vm375_vm3 = vweird.f32 %v341_v57  ;;  %v379_v4 = vand.u32 2147483647, %v341_v57  ;;  %v381_v5 = vand.u32 2147483648, %v341_v57 }
  0x5b   : > { %v359_v61 = vrot.slane %v358_v59, 2  ;;  %669 = vrcp.f32 %v348_v58  ;;  %v366_v62 = vrot.slane %v365_v60, 2  ;;  %vm389_vm4 = vweird.f32 %v348_v58 }
  0x5c   : > { %v395_v11 = vand.u32 2147483648, %v348_v58  ;;  %v393_v14 = vand.u32 2147483647, %v348_v58  ;;  %v382_v16 = vor.u32 1.1754944e-38, %v381_v5  ;;  %vm380_vm8 = vcmp.eq.f32.partialorder %v379_v4, 8.507059e+37 }
  0x5d   : > { %v360_v63 = vmax.f32 %v358_v59, %v359_v61  ;;  %v367_v1 = vmax.f32 %v365_v60, %v366_v62 }
  0x5e   : > { %v396_v20 = vor.u32 1.1754944e-38, %v395_v11  ;;  %vm394_vm10 = vcmp.eq.f32.partialorder %v393_v14, 8.507059e+37 }
  0x5f   : > { %v361_v9 = vrot.slane %v360_v63, 1  ;;  %v368_v12 = vrot.slane %v367_v1, 1 }
  0x60   : > { %v668_v0 = vpop.eup %667 }
  0x61   : > { %v670_v2 = vpop.eup %669  ;;  %v371_v3 = vmul.f32 %v668_v0, %v341_v57  ;;  %vm376_vm5 = vweird.f32 %v668_v0  ;;  %v362_v18 = vmax.f32 %v360_v63, %v361_v9  ;;  %v369_v21 = vmax.f32 %v367_v1, %v368_v12 }
  0x62   : > { %v385_v8 = vmul.f32 %v670_v2, %v348_v58  ;;  %vm390_vm6 = vweird.f32 %v670_v2  ;;  %vm377_vm7 = vmor %vm375_vm3, %vm376_vm5 }
  0x63   : > { %v372_v10 = vsub.f32 1.0, %v371_v3  ;;  %vm391_vm9 = vmor %vm389_vm4, %vm390_vm6 }
  0x64   : > { %v386_v13 = vsub.f32 1.0, %v385_v8 }
  0x65   : > { %v373_v15 = vmul.f32 %v668_v0, %v372_v10 }
  0x66   : > { %v387_v17 = vmul.f32 %v670_v2, %v386_v13 }
  0x67   : > { %v374_v19 = vadd.f32 %v668_v0, %v373_v15 }
  0x68   : > { %v388_v22 = vadd.f32 %v670_v2, %v387_v17 }
  0x69   : > { %v378_v23 = vsel %vm377_vm7, %v668_v0, %v374_v19 }
  0x6a   : > { %v383_v24 = vsel %vm380_vm8, %v382_v16, %v378_v23  ;;  %v392_v25 = vsel %vm391_vm9, %v670_v2, %v388_v22 }
  0x6b   : > { %v397_v26 = vsel %vm394_vm10, %v396_v20, %v392_v25  ;;  %v398_v27 = vmul.f32 %v383_v24, %v362_v18 }
  0x6c   : > { %v399_v28 = vmul.f32 %v397_v26, %v369_v21 }
  0x6d   : > { %v400_v29 = vadd.f32 1e-05, %v398_v27 }
  0x6e   : > { %v401_v30 = vadd.f32 1e-05, %v399_v28 }
  0x6f   : > { %671 = vlog2.f32 %v400_v29  ;;  %v406_v31 = vsub.f32 1.0, %v400_v29 }
  0x70   : > { %673 = vlog2.f32 %v401_v30  ;;  %v407_v32 = vsub.f32 1.0, %v401_v30 }
  0x71   : > { %v408_v33 = vmul.f32 %v406_v31, %v406_v31 }
  0x72   : > { %v409_v35 = vmul.f32 %v407_v32, %v407_v32 }
  0x75   : > { %v672_v34 = vpop.eup %671 }
  0x76   : > { %v674_v36 = vpop.eup %673  ;;  %v403_v37 = vmul.f32 0.6931472, %v672_v34 }
  0x77   : > { %v405_v38 = vmul.f32 0.6931472, %v674_v36 }
  0x78   : > { %v410_v39 = vmul.f32 %v408_v33, %v403_v37 }
  0x79   : > { %v411_v40 = vmul.f32 %v409_v35, %v405_v38 }
  0x7a   : > { %v423_v41 = vsel %vm893_vm0, %v410_v39, 0.0 }
  0x7b   : > { %v424_v42 = vsel %vm897_vm1, %v411_v40, 0.0  ;;  %v425_v43 = vsel %vm306_vm2, %v423_v41, 0.0 }
  0x7c   : > { %v426_v44 = vsel %vm306_vm2, %v424_v42, 0.0 }
  0x7d   : > { %v427_v45 = vadd.f32 %v426_v44, %v425_v43 }
  0x7f   : > { %428 = vadd.xlane.f32.xlu0 %v427_v45 }
  0x9d   : > { %v422_v46 = vpop.xlane.xlu0 %421 }
  0x9e   : > { %431 = vst.msk [vmem:[%s269_s8] sm:$0xf] %vm430_vm11, %v422_v46 }
  0xf2   : > { %v429_v6 = vpop.xlane.xlu0 %428 }
  0xf3   : > { %432 = vst.msk [vmem:[%s276_s11] sm:$0xf] %vm430_vm11, %v429_v6 }
  0xf4 PF: > { %s20_s17 = sadd.s32 1, %s789_s17   ;;  %s962_s12 = smov %s773_s13 }
  0xf5   : > { %p17_p0 = scmp.ge.s32.totalorder %s20_s17, 4   ;;  %s963_s13 = smov %s777_s14 }
  0xf6   : > { %s964_s14 = smov %s861_s24  ;;  %s965_s15 = smov %s785_s16 }
  0xf7   : > { %s966_s16 = smov %s968_s19  ;;  %19 = sbr.rel (!%p17_p0) target bundleno = 6 (0x6), region = 93 }
  0xfc   :  { %478 = vsyncpa [#allocation3], 1 }
  0xfd   :  { %480 = vsyncpa [#allocation3 + $0x1], 1 }
  0xfe   :  { %481 = vsyncpa [#allocation5], 1 }
  0xff   :  { %483 = vsyncpa [#allocation5 + $0x1], 1 }

</bundles_post_ra>
